<compile_context>
chip_gen: v7x
topology: tpu7x:2x2x1
jax: 0.10.0
libtpu: 0.0.40
codegen_flags: <defaults>
</compile_context>

<pallas_src>
import numpy as np
import jax
import jax.numpy as jnp
from jax.experimental import pallas as pl
from jax.experimental.pallas import tpu as pltpu

# ---------------- static model configuration (small example shapes) ----------
B = 2                       # batch
CIN, H, W = 4, 16, 16       # module input is NCHW, like nn.Conv2d
CONV_LAYERS = (8, 8)
LINEAR_LAYERS = (32,)
DIM_OUT = 10
KSZ, STRIDE = 5, 2
EPS = 1e-5

CP = 128                                 # lane width
C1, C2 = CONV_LAYERS
OH1 = (H - KSZ) // STRIDE + 1            # 6
OW1 = (W - KSZ) // STRIDE + 1            # 6
OH2 = (OH1 - KSZ) // STRIDE + 1          # 1
OW2 = (OW1 - KSZ) // STRIDE + 1          # 1
assert (OH1, OW1, OH2, OW2) == (6, 6, 1, 1)   # rep_size == 1 for this config

MR = 16                                  # conv1 LHS rows: OH1*B=12 padded to 16
K1 = KSZ * W * CIN                       # 320 real conv1 reduction features
K1P = 384                                # padded to a lane-tile multiple
K2P = KSZ * CP                           # 640 = conv2 packed reduction width
KTOT = K1P + K2P + CP + CP               # 1280 rows of the fused weight slab


# ---------------------------------------------------------------------------
# The fused kernel: whole batch in one invocation, ~4 MXU matmuls.
# ---------------------------------------------------------------------------
def _cnn_kernel(xr_ref, w_ref, b_ref, o_ref, a1_ref, p2_ref):
    # ---- conv1 + folded BN + ReLU: ONE dot, K=(kh,w,cin) packed into lanes.
    # rows = (oh, b); output lanes = (ow, c1) (48 real lanes).
    acc1 = jnp.dot(xr_ref[...], w_ref[pl.ds(0, K1P), :],
                   preferred_element_type=jnp.float32)               # [16,128]
    a1_ref[...] = jnp.maximum(acc1 + b_ref[pl.ds(0, 1), :],
                              0.0).astype(jnp.bfloat16)

    # ---- pack conv2 LHS: p2[b, kh*128 + (ow*8+c1)] = a1[(oh=kh, b), ow*8+c1]
    # Five 128-lane-aligned [B,128] copies; pad rows/lanes zero-filled so the
    # matmul never reads stale VMEM.
    p2_ref[...] = jnp.zeros_like(p2_ref)
    for kh in range(KSZ):
        p2_ref[pl.ds(0, B), pl.ds(kh * CP, CP)] = a1_ref[pl.ds(kh * B, B), :]

    # ---- conv2 (1x1 spatial output) + folded BN + ReLU: ONE dot, K=640 ----
    acc2 = jnp.dot(p2_ref[...], w_ref[pl.ds(K1P, K2P), :],
                   preferred_element_type=jnp.float32)                # [8,128]
    h = jnp.maximum(acc2 + b_ref[pl.ds(1, 1), :], 0.0).astype(jnp.bfloat16)

    # ---- fc1 + ReLU ----
    acc3 = jnp.dot(h, w_ref[pl.ds(K1P + K2P, CP), :],
                   preferred_element_type=jnp.float32)
    h = jnp.maximum(acc3 + b_ref[pl.ds(2, 1), :], 0.0).astype(jnp.bfloat16)

    # ---- fc2 + ReLU (the module's fc_layer applies ReLU on the last layer) --
    acc4 = jnp.dot(h, w_ref[pl.ds(K1P + K2P + CP, CP), :],
                   preferred_element_type=jnp.float32)
    o_ref[...] = jnp.maximum(acc4 + b_ref[pl.ds(3, 1), :], 0.0)       # [8,128]


def _fused_cnn(xr, wall, ball):
    flops = 2 * (MR * K1P * CP + 8 * K2P * CP + 2 * 8 * CP * CP)
    bytes_accessed = (xr.size * 2 + wall.size * 2 + ball.size * 4 + 8 * CP * 4)
    return pl.pallas_call(
        _cnn_kernel,
        out_shape=jax.ShapeDtypeStruct((8, CP), jnp.float32),
        grid=(1,),
        in_specs=[
            pl.BlockSpec((MR, K1P), lambda i: (0, 0)),      # conv1 row-slab
            pl.BlockSpec((KTOT, CP), lambda i: (0, 0)),     # all weights, fused
            pl.BlockSpec((8, CP), lambda i: (0, 0)),        # all biases, fused
        ],
        out_specs=pl.BlockSpec((8, CP), lambda i: (0, 0)),
        scratch_shapes=[
            pltpu.VMEM((MR, CP), jnp.bfloat16),             # conv1 activations
            pltpu.VMEM((8, K2P), jnp.bfloat16),             # packed conv2 LHS
        ],
        compiler_params=pltpu.CompilerParams(
            dimension_semantics=("arbitrary",)),
        cost_estimate=pl.CostEstimate(flops=flops, transcendentals=0,
                                      bytes_accessed=bytes_accessed),
    )(xr, wall, ball)


# ---------------------------------------------------------------------------
# One-time host-side parameter prep: fold BN into conv weights, pack the conv
# reductions into the lane dimension, concatenate everything into one weight
# slab (bf16) and one bias slab (f32).
# ---------------------------------------------------------------------------
def prepare_params(params):
    (cw1, cb1, g1, be1, m1, v1), (cw2, cb2, g2, be2, m2, v2) = params["conv"]
    (fw1, fb1), (fw2, fb2) = params["fc"]

    def fold(w, b, g, be, m, v):
        s = np.asarray(g) / np.sqrt(np.asarray(v) + EPS)
        wf = np.asarray(w) * s[:, None, None, None]
        bf = (np.asarray(b) - np.asarray(m)) * s + np.asarray(be)
        return wf.astype(np.float32), bf.astype(np.float32)

    w1f, b1f = fold(cw1, cb1, g1, be1, m1, v1)        # [C1,CIN,5,5], [C1]
    w2f, b2f = fold(cw2, cb2, g2, be2, m2, v2)        # [C2,C1,5,5], [C2]

    # conv1 "row-Toeplitz" weight: rows (kh, w, cin) -> cols (ow, c1)
    t1 = np.zeros((KSZ, W, CIN, OW1, C1), np.float32)
    for ow in range(OW1):
        for kw in range(KSZ):
            # value at [kh, cin, c1] = w1f[c1, cin, kh, kw]
            t1[:, STRIDE * ow + kw, :, ow, :] = w1f[:, :, :, kw].transpose(2, 1, 0)
    W1T = np.zeros((K1P, CP), np.float32)
    W1T[:K1, :OW1 * C1] = t1.reshape(K1, OW1 * C1)

    # conv2 weight with K = (kh, conv1-lane-block): rows kh*128 + kw*8 + ci
    t2 = np.zeros((KSZ, CP, C2), np.float32)
    for kh in range(KSZ):
        for kw in range(KSZ):
            t2[kh, kw * C1:(kw + 1) * C1, :] = w2f[:, :, kh, kw].T   # [ci, c2]
    W2P = np.zeros((K2P, CP), np.float32)
    W2P[:, :C2] = t2.reshape(K2P, C2)

    # fc layers (transposed, zero-padded).  rep_size == 1 so the NCHW flatten
    # order equals the channel order -> no input permutation needed.
    WF1 = np.zeros((CP, CP), np.float32)
    WF1[:C2, :LINEAR_LAYERS[0]] = np.asarray(fw1).T
    WF2 = np.zeros((CP, CP), np.float32)
    WF2[:LINEAR_LAYERS[0], :DIM_OUT] = np.asarray(fw2).T

    wall = jnp.asarray(np.concatenate([W1T, W2P, WF1, WF2], axis=0),
                       dtype=jnp.bfloat16)                    # [1280, 128]

    ball = np.zeros((8, CP), np.float32)
    ball[0, :OW1 * C1] = np.tile(b1f, OW1)                    # conv1 bias per (ow, c1)
    ball[1, :C2] = b2f
    ball[2, :LINEAR_LAYERS[0]] = np.asarray(fb1)
    ball[3, :DIM_OUT] = np.asarray(fb2)
    return wall, jnp.asarray(ball)


@jax.jit
def customizable_cnn_forward(x, prepped):
    wall, ball = prepped
    # Cheap host-side input prep (8 KiB input): build the conv1 row-slab
    #   XR[oh*B + b, kh*W*CIN + w*CIN + c] = x_nhwc[b, 2*oh + kh, w, c]
    xh = jnp.transpose(x, (0, 2, 3, 1)).astype(jnp.float32)           # NHWC
    win = jnp.stack([xh[:, STRIDE * oh:STRIDE * oh + KSZ] for oh in range(OH1)],
                    axis=0)                                           # [6,B,5,16,4]
    rows = win.reshape(OH1 * B, K1)                                   # [12, 320]
    xr = jnp.pad(rows, ((0, MR - OH1 * B), (0, K1P - K1))).astype(jnp.bfloat16)
    out = _fused_cnn(xr, wall, ball)
    return out[:B, :DIM_OUT]


# ---------------------------------------------------------------------------
# Deterministic parameter init (PyTorch-like shapes) and a pure-JAX reference.
# ---------------------------------------------------------------------------
def init_params(key, in_ch, conv_layers, linear_layers, dim_out, conv_size, rep_size):
    params = {"conv": [], "fc": []}
    chans = [in_ch] + list(conv_layers)
    for cin, cout in zip(chans, chans[1:]):
        key, k1, k2, k3, k4, k5, k6 = jax.random.split(key, 7)
        fan_in = cin * conv_size * conv_size
        bound = 1.0 / jnp.sqrt(fan_in)
        w = jax.random.uniform(k1, (cout, cin, conv_size, conv_size),
                               jnp.float32, -bound, bound)
        b = jax.random.uniform(k2, (cout,), jnp.float32, -bound, bound)
        gamma = 1.0 + 0.1 * jax.random.normal(k3, (cout,), jnp.float32)
        beta = 0.1 * jax.random.normal(k4, (cout,), jnp.float32)
        mean = 0.1 * jax.random.normal(k5, (cout,), jnp.float32)
        var = jnp.abs(1.0 + 0.1 * jax.random.normal(k6, (cout,), jnp.float32))
        params["conv"].append((w, b, gamma, beta, mean, var))
    sizes = [conv_layers[-1] * int(rep_size) ** 2] + list(linear_layers) + [dim_out]
    for fin, fout in zip(sizes, sizes[1:]):
        key, k1, k2 = jax.random.split(key, 3)
        bound = 1.0 / jnp.sqrt(fin)
        w = jax.random.uniform(k1, (fout, fin), jnp.float32, -bound, bound)
        b = jax.random.uniform(k2, (fout,), jnp.float32, -bound, bound)
        params["fc"].append((w, b))
    return params


@jax.jit
def reference_forward(x, params):
    out = x
    for (w, b, g, be, m, v) in params["conv"]:
        out = jax.lax.conv_general_dilated(
            out, w, (STRIDE, STRIDE), "VALID",
            dimension_numbers=("NCHW", "OIHW", "NCHW"))
        out = out + b[None, :, None, None]
        out = (out - m[None, :, None, None]) / jnp.sqrt(v[None, :, None, None] + EPS)
        out = out * g[None, :, None, None] + be[None, :, None, None]
        out = jnp.maximum(out, 0.0)
    out = out.reshape(out.shape[0], -1)
    for (w, b) in params["fc"]:
        out = jnp.maximum(out @ w.T + b, 0.0)
    return out


if __name__ == "__main__":
    # rep_size exactly as computed in CustomizableCNN.__init__
    rep_size = H
    for _ in range(len(CONV_LAYERS)):
        rep_size -= KSZ - 1
        rep_size /= STRIDE
        rep_size = int(rep_size)
    assert rep_size == 1

    key = jax.random.PRNGKey(0)
    key, kx, kp = jax.random.split(key, 3)
    x = jax.random.normal(kx, (B, CIN, H, W), jnp.float32)
    params = init_params(kp, CIN, CONV_LAYERS, LINEAR_LAYERS, DIM_OUT,
                         KSZ, rep_size)
    prepped = prepare_params(params)

    out = customizable_cnn_forward(x, prepped)
    out = jax.block_until_ready(out)
    assert out.shape == (B, DIM_OUT), out.shape
    assert bool(jnp.all(out >= 0.0))  # final fc_layer has ReLU too

    ref = reference_forward(x, params)
    assert bool(jnp.allclose(out, ref, atol=8e-2, rtol=8e-2)), (
        float(jnp.max(jnp.abs(out - ref))))
    print("KERNEL_OK")
</pallas_src>

<mosaic_0001>
module attributes {stable_mosaic.version = 11 : i64} {
  func.func @_cnn_kernel(%arg0: i32, %arg1: memref<16x384xbf16, #tpu.memory_space<vmem>>, %arg2: memref<1280x128xbf16, #tpu.memory_space<vmem>>, %arg3: memref<8x128xf32, #tpu.memory_space<vmem>>, %arg4: memref<8x128xf32, #tpu.memory_space<vmem>>, %arg5: memref<16x128xbf16, #tpu.memory_space<vmem>>, %arg6: memref<8x640xbf16, #tpu.memory_space<vmem>>) attributes {dimension_semantics = [#tpu.dimension_semantics<arbitrary>], iteration_bounds = array<i64: 1>, scalar_prefetch = 0 : i64, scratch_operands = 2 : i64, tpu.core_type = #tpu.core_type<tc>, window_params = [{pipeline_mode = #tpu.pipeline_mode<synchronous>, transform_indices = @transform_0, window_bounds = array<i64: 16, 384>}, {pipeline_mode = #tpu.pipeline_mode<synchronous>, transform_indices = @transform_1, window_bounds = array<i64: 1280, 128>}, {pipeline_mode = #tpu.pipeline_mode<synchronous>, transform_indices = @transform_2, window_bounds = array<i64: 8, 128>}, {pipeline_mode = #tpu.pipeline_mode<synchronous>, transform_indices = @transform_3, window_bounds = array<i64: 8, 128>}]} {
    %c0 = arith.constant 0 : index
    %c0_0 = arith.constant 0 : index
    %0 = vector.load %arg1[%c0, %c0_0] : memref<16x384xbf16, #tpu.memory_space<vmem>>, vector<16x384xbf16>
    %c0_1 = arith.constant 0 : index
    %c0_2 = arith.constant 0 : index
    %1 = vector.load %arg2[%c0_1, %c0_2] : memref<1280x128xbf16, #tpu.memory_space<vmem>>, vector<384x128xbf16>
    %cst = arith.constant dense<0.000000e+00> : vector<16x128xf32>
    %2 = tpu.matmul %0, %1, %cst {dimension_numbers = #tpu.dot_dimension_numbers<[1], [0], [0], [1], [0, 0, 1, 1], [], []>} : vector<16x384xbf16>, vector<384x128xbf16>, vector<16x128xf32> -> vector<16x128xf32>
    %c0_3 = arith.constant 0 : index
    %c0_4 = arith.constant 0 : index
    %3 = vector.load %arg3[%c0_3, %c0_4] : memref<8x128xf32, #tpu.memory_space<vmem>>, vector<1x128xf32>
    %4 = vector.broadcast %3 : vector<1x128xf32> to vector<16x128xf32>
    %5 = arith.addf %2, %4 : vector<16x128xf32>
    %cst_5 = arith.constant 0.000000e+00 : f32
    %6 = vector.broadcast %cst_5 : f32 to vector<16x128xf32>
    %7 = arith.maximumf %5, %6 : vector<16x128xf32>
    %8 = arith.truncf %7 : vector<16x128xf32> to vector<16x128xbf16>
    %c0_6 = arith.constant 0 : index
    %c0_7 = arith.constant 0 : index
    %9 = vector.load %arg5[%c0_6, %c0_7] : memref<16x128xbf16, #tpu.memory_space<vmem>>, vector<16x128xbf16>
    tpu.vector_store %arg5[%c0_6, %c0_7], %8 {strides = array<i32>} : memref<16x128xbf16, #tpu.memory_space<vmem>>, vector<16x128xbf16>,
    %cst_8 = arith.constant 0.000000e+00 : bf16
    %10 = vector.broadcast %cst_8 : bf16 to vector<8x640xbf16>
    %c0_9 = arith.constant 0 : index
    %c0_10 = arith.constant 0 : index
    %11 = vector.load %arg6[%c0_9, %c0_10] : memref<8x640xbf16, #tpu.memory_space<vmem>>, vector<8x640xbf16>
    tpu.vector_store %arg6[%c0_9, %c0_10], %10 {strides = array<i32>} : memref<8x640xbf16, #tpu.memory_space<vmem>>, vector<8x640xbf16>,
    %c0_11 = arith.constant 0 : index
    %c0_12 = arith.constant 0 : index
    %12 = vector.load %arg5[%c0_11, %c0_12] : memref<16x128xbf16, #tpu.memory_space<vmem>>, vector<2x128xbf16>
    %c0_13 = arith.constant 0 : index
    %c0_14 = arith.constant 0 : index
    %13 = vector.load %arg6[%c0_13, %c0_14] : memref<8x640xbf16, #tpu.memory_space<vmem>>, vector<2x128xbf16>
    tpu.vector_store %arg6[%c0_13, %c0_14], %12 {strides = array<i32>} : memref<8x640xbf16, #tpu.memory_space<vmem>>, vector<2x128xbf16>,
    %c2 = arith.constant 2 : index
    %c0_15 = arith.constant 0 : index
    %14 = vector.load %arg5[%c2, %c0_15] : memref<16x128xbf16, #tpu.memory_space<vmem>>, vector<2x128xbf16>
    %c0_16 = arith.constant 0 : index
    %c128 = arith.constant 128 : index
    %15 = vector.load %arg6[%c0_16, %c128] : memref<8x640xbf16, #tpu.memory_space<vmem>>, vector<2x128xbf16>
    tpu.vector_store %arg6[%c0_16, %c128], %14 {strides = array<i32>} : memref<8x640xbf16, #tpu.memory_space<vmem>>, vector<2x128xbf16>,
    %c4 = arith.constant 4 : index
    %c0_17 = arith.constant 0 : index
    %16 = vector.load %arg5[%c4, %c0_17] : memref<16x128xbf16, #tpu.memory_space<vmem>>, vector<2x128xbf16>
    %c0_18 = arith.constant 0 : index
    %c256 = arith.constant 256 : index
    %17 = vector.load %arg6[%c0_18, %c256] : memref<8x640xbf16, #tpu.memory_space<vmem>>, vector<2x128xbf16>
    tpu.vector_store %arg6[%c0_18, %c256], %16 {strides = array<i32>} : memref<8x640xbf16, #tpu.memory_space<vmem>>, vector<2x128xbf16>,
    %c6 = arith.constant 6 : index
    %c0_19 = arith.constant 0 : index
    %18 = vector.load %arg5[%c6, %c0_19] : memref<16x128xbf16, #tpu.memory_space<vmem>>, vector<2x128xbf16>
    %c0_20 = arith.constant 0 : index
    %c384 = arith.constant 384 : index
    %19 = vector.load %arg6[%c0_20, %c384] : memref<8x640xbf16, #tpu.memory_space<vmem>>, vector<2x128xbf16>
    tpu.vector_store %arg6[%c0_20, %c384], %18 {strides = array<i32>} : memref<8x640xbf16, #tpu.memory_space<vmem>>, vector<2x128xbf16>,
    %c8 = arith.constant 8 : index
    %c0_21 = arith.constant 0 : index
    %20 = vector.load %arg5[%c8, %c0_21] : memref<16x128xbf16, #tpu.memory_space<vmem>>, vector<2x128xbf16>
    %c0_22 = arith.constant 0 : index
    %c512 = arith.constant 512 : index
    %21 = vector.load %arg6[%c0_22, %c512] : memref<8x640xbf16, #tpu.memory_space<vmem>>, vector<2x128xbf16>
    tpu.vector_store %arg6[%c0_22, %c512], %20 {strides = array<i32>} : memref<8x640xbf16, #tpu.memory_space<vmem>>, vector<2x128xbf16>,
    %c0_23 = arith.constant 0 : index
    %c0_24 = arith.constant 0 : index
    %22 = vector.load %arg6[%c0_23, %c0_24] : memref<8x640xbf16, #tpu.memory_space<vmem>>, vector<8x640xbf16>
    %c384_25 = arith.constant 384 : index
    %c0_26 = arith.constant 0 : index
    %23 = vector.load %arg2[%c384_25, %c0_26] : memref<1280x128xbf16, #tpu.memory_space<vmem>>, vector<640x128xbf16>
    %cst_27 = arith.constant dense<0.000000e+00> : vector<8x128xf32>
    %24 = tpu.matmul %22, %23, %cst_27 {dimension_numbers = #tpu.dot_dimension_numbers<[1], [0], [0], [1], [0, 0, 1, 1], [], []>} : vector<8x640xbf16>, vector<640x128xbf16>, vector<8x128xf32> -> vector<8x128xf32>
    %c1 = arith.constant 1 : index
    %c0_28 = arith.constant 0 : index
    %25 = vector.load %arg3[%c1, %c0_28] : memref<8x128xf32, #tpu.memory_space<vmem>>, vector<1x128xf32>
    %26 = vector.broadcast %25 : vector<1x128xf32> to vector<8x128xf32>
    %27 = arith.addf %24, %26 : vector<8x128xf32>
    %cst_29 = arith.constant 0.000000e+00 : f32
    %28 = vector.broadcast %cst_29 : f32 to vector<8x128xf32>
    %29 = arith.maximumf %27, %28 : vector<8x128xf32>
    %30 = arith.truncf %29 : vector<8x128xf32> to vector<8x128xbf16>
    %c1024 = arith.constant 1024 : index
    %c0_30 = arith.constant 0 : index
    %31 = vector.load %arg2[%c1024, %c0_30] : memref<1280x128xbf16, #tpu.memory_space<vmem>>, vector<128x128xbf16>
    %cst_31 = arith.constant dense<0.000000e+00> : vector<8x128xf32>
    %32 = tpu.matmul %30, %31, %cst_31 {dimension_numbers = #tpu.dot_dimension_numbers<[1], [0], [0], [1], [0, 0, 1, 1], [], []>} : vector<8x128xbf16>, vector<128x128xbf16>, vector<8x128xf32> -> vector<8x128xf32>
    %c2_32 = arith.constant 2 : index
    %c0_33 = arith.constant 0 : index
    %33 = vector.load %arg3[%c2_32, %c0_33] : memref<8x128xf32, #tpu.memory_space<vmem>>, vector<1x128xf32>
    %34 = vector.broadcast %33 : vector<1x128xf32> to vector<8x128xf32>
    %35 = arith.addf %32, %34 : vector<8x128xf32>
    %cst_34 = arith.constant 0.000000e+00 : f32
    %36 = vector.broadcast %cst_34 : f32 to vector<8x128xf32>
    %37 = arith.maximumf %35, %36 : vector<8x128xf32>
    %38 = arith.truncf %37 : vector<8x128xf32> to vector<8x128xbf16>
    %c1152 = arith.constant 1152 : index
    %c0_35 = arith.constant 0 : index
    %39 = vector.load %arg2[%c1152, %c0_35] : memref<1280x128xbf16, #tpu.memory_space<vmem>>, vector<128x128xbf16>
    %cst_36 = arith.constant dense<0.000000e+00> : vector<8x128xf32>
    %40 = tpu.matmul %38, %39, %cst_36 {dimension_numbers = #tpu.dot_dimension_numbers<[1], [0], [0], [1], [0, 0, 1, 1], [], []>} : vector<8x128xbf16>, vector<128x128xbf16>, vector<8x128xf32> -> vector<8x128xf32>
    %c3 = arith.constant 3 : index
    %c0_37 = arith.constant 0 : index
    %41 = vector.load %arg3[%c3, %c0_37] : memref<8x128xf32, #tpu.memory_space<vmem>>, vector<1x128xf32>
    %42 = vector.broadcast %41 : vector<1x128xf32> to vector<8x128xf32>
    %43 = arith.addf %40, %42 : vector<8x128xf32>
    %cst_38 = arith.constant 0.000000e+00 : f32
    %44 = vector.broadcast %cst_38 : f32 to vector<8x128xf32>
    %45 = arith.maximumf %43, %44 : vector<8x128xf32>
    %c0_39 = arith.constant 0 : index
    %c0_40 = arith.constant 0 : index
    %46 = vector.load %arg4[%c0_39, %c0_40] : memref<8x128xf32, #tpu.memory_space<vmem>>, vector<8x128xf32>
    tpu.vector_store %arg4[%c0_39, %c0_40], %45 {strides = array<i32>} : memref<8x128xf32, #tpu.memory_space<vmem>>, vector<8x128xf32>,
    return
  }
  func.func @transform_0(%arg0: i32) -> (i32, i32) {
    %c0_i32 = arith.constant 0 : i32
    %c0_i32_0 = arith.constant 0 : i32
    %c0_i32_1 = arith.constant 0 : i32
    return %c0_i32, %c0_i32_0 : i32, i32
  }
  func.func @transform_1(%arg0: i32) -> (i32, i32) {
    %c0_i32 = arith.constant 0 : i32
    %c0_i32_0 = arith.constant 0 : i32
    %c0_i32_1 = arith.constant 0 : i32
    return %c0_i32, %c0_i32_0 : i32, i32
  }
  func.func @transform_2(%arg0: i32) -> (i32, i32) {
    %c0_i32 = arith.constant 0 : i32
    %c0_i32_0 = arith.constant 0 : i32
    %c0_i32_1 = arith.constant 0 : i32
    return %c0_i32, %c0_i32_0 : i32, i32
  }
  func.func @transform_3(%arg0: i32) -> (i32, i32) {
    %c0_i32 = arith.constant 0 : i32
    %c0_i32_0 = arith.constant 0 : i32
    %c0_i32_1 = arith.constant 0 : i32
    return %c0_i32, %c0_i32_0 : i32, i32
  }
}

</mosaic_0001>

<bundles_post_ra>
// kernel: customizable_cnn_forward.1
= control target key start
LH: loop header
LB: loop body
LE: loop exit
PB: predicated region body
PF: predicated region fallthrough
CT: control target
= control target key end

     0   :  { %v1424_v1 = vmov 0.0   ;;  %vm1425_vm0 = vmmov 0   ;;  %v1426_v39 = vmov 0   ;;  %s1751_s1 = inlined_call_operand.vmem [shape: bf16[1280,128], index: 1, kind: input, shape index: {}]   ;;  %s1752_s0 = inlined_call_operand.vmem [shape: bf16[16,384], index: 0, kind: input, shape index: {}]   ;;  %s1753_s2 = inlined_call_operand.vmem [shape: f32[8,128], index: 2, kind: input, shape index: {}]   ;;  %s1754_s3 = inlined_call_operand.vmem [shape: f32[8,128], index: 3, kind: output, shape index: {}]  }
   0x1   :  { %v1331_v0 = vld [vmem:[%s1751_s1 + $0x40] sm:$0xff]   ;;  %1248 = vmatprep.subr.bf16.mxu1 %v1424_v1  ;;  %1264 = vmatprep.mubr.msk.bf16.mxu1 %vm1425_vm0, %v1424_v1  ;;  %v1334_v4 = vld [vmem:[%s1751_s1 + $0x48] sm:$0xff]   ;;  %v1337_v7 = vld [vmem:[%s1751_s1 + $0x50] sm:$0xff]   ;;  %318 = vst [vmem:[#allocation3] sm:$0xff] %v1426_v39 }
   0x2   :  { %v1332_v2 = vld [vmem:[%s1751_s1] sm:$0xff]   ;;  %1146 = vmatprep.subr.bf16.mxu0 %v1331_v0  ;;  %v1335_v5 = vld [vmem:[%s1751_s1 + $0x8] sm:$0xff]   ;;  %v1338_v8 = vld [vmem:[%s1751_s1 + $0x10] sm:$0xff]   ;;  %320 = vst [vmem:[#allocation3 + $0x10] sm:$0xf] %v1426_v39 }
   0x3   :  { %v1333_v3 = vld [vmem:[%s1751_s1 + $0x80] sm:$0xff]   ;;  %1147 = vmatpush3.bf16.msra.mxu0 %v1332_v2  ;;  %v1336_v6 = vld [vmem:[%s1751_s1 + $0x88] sm:$0xff]   ;;  %v1339_v9 = vld [vmem:[%s1751_s1 + $0x90] sm:$0xff]   ;;  %319 = vst [vmem:[#allocation3 + $0x8] sm:$0xff] %v1426_v39 }
   0x4   :  { %1249 = vmatpush3.bf16.msra.mxu1 %v1333_v3  ;;  %1148 = vmatprep.subr.bf16.mxu0 %v1334_v4  ;;  %v1340_v10 = vld [vmem:[%s1751_s1 + $0x58] sm:$0xff]   ;;  %v1343_v13 = vld [vmem:[%s1751_s1 + $0x60] sm:$0xff]   ;;  %v1346_v16 = vld [vmem:[%s1751_s1 + $0x68] sm:$0xff]  }
   0x5   :  { %1250 = vmatprep.subr.bf16.mxu1 %v1424_v1  ;;  %v1341_v11 = vld [vmem:[%s1751_s1 + $0x18] sm:$0xff]   ;;  %v1344_v14 = vld [vmem:[%s1751_s1 + $0x20] sm:$0xff]   ;;  %v1347_v17 = vld [vmem:[%s1751_s1 + $0x28] sm:$0xff]  }
   0x6   :  { %v1342_v12 = vld [vmem:[%s1751_s1 + $0x98] sm:$0xff]   ;;  %v1345_v15 = vld [vmem:[%s1751_s1 + $0xa0] sm:$0xff]   ;;  %v1348_v18 = vld [vmem:[%s1751_s1 + $0xa8] sm:$0xff]  }
   0x7   :  { %1149 = vmatpush3.bf16.msra.mxu0 %v1335_v5  ;;  %v1349_v19 = vld [vmem:[%s1751_s1 + $0x70] sm:$0xff]   ;;  %v1352_v22 = vld [vmem:[%s1751_s1 + $0x78] sm:$0xff]   ;;  %v1354_v26 = vld [vmem:[%s1752_s0] ss:$12 sps:$4 sm:$0xff]  }
   0x8   :  { %1251 = vmatpush3.bf16.msra.mxu1 %v1336_v6  ;;  %1150 = vmatprep.subr.bf16.mxu0 %v1337_v7  ;;  %v1350_v20 = vld [vmem:[%s1751_s1 + $0x30] sm:$0xff]   ;;  %v1353_v24 = vld [vmem:[%s1751_s1 + $0x38] sm:$0xff]   ;;  %v1363_v28 = vld [vmem:[%s1751_s1 + $0x100] sm:$0xff]  }
   0x9   :  { %1252 = vmatprep.subr.bf16.mxu1 %v1424_v1  ;;  %v1351_v21 = vld [vmem:[%s1751_s1 + $0xb0] sm:$0xff]   ;;  %v1357_v25 = vld [vmem:[%s1751_s1 + $0xb8] sm:$0xff]   ;;  %v1364_v29 = vld [vmem:[%s1751_s1 + $0xc0] sm:$0xff]  }
   0xa   :  { %v1356_v23 = vld [vmem:[%s1752_s0 + $0x4] ss:$12 sps:$4 sm:$0xff]   ;;  %v1358_v27 = vld [vmem:[%s1752_s0 + $0x8] ss:$12 sps:$4 sm:$0xff]   ;;  %v1375_v41 = vld [vmem:[%s1751_s1 + $0x118] sm:$0xff]  }
   0xb   :  { %1151 = vmatpush3.bf16.msra.mxu0 %v1338_v8  ;;  %264 = vmatprep.mubr.bf16.mxu0 %v1356_v23  ;;  %v1365_v30 = vld [vmem:[%s1751_s1 + $0x180] sm:$0xff]   ;;  %v1367_v32 = vld [vmem:[%s1751_s1 + $0x108] sm:$0xff]   ;;  %v1371_v36 = vld [vmem:[%s1751_s1 + $0x110] sm:$0xff]  }
   0xc   :  { %1253 = vmatpush3.bf16.msra.mxu1 %v1339_v9  ;;  %1152 = vmatprep.subr.bf16.mxu0 %v1340_v10  ;;  %v1366_v31 = vld [vmem:[%s1751_s1 + $0x140] sm:$0xff]   ;;  %v1368_v33 = vld [vmem:[%s1751_s1 + $0xc8] sm:$0xff]   ;;  %v1372_v37 = vld [vmem:[%s1751_s1 + $0xd0] sm:$0xff]  }
   0xd   :  { %1254 = vmatprep.subr.bf16.mxu1 %v1424_v1  ;;  %v1369_v34 = vld [vmem:[%s1751_s1 + $0x188] sm:$0xff]   ;;  %v1373_v38 = vld [vmem:[%s1751_s1 + $0x190] sm:$0xff]   ;;  %v1376_v42 = vld [vmem:[%s1751_s1 + $0xd8] sm:$0xff]  }
   0xe   :  { %v1370_v35 = vld [vmem:[%s1751_s1 + $0x148] sm:$0xff]   ;;  %v1374_v40 = vld [vmem:[%s1751_s1 + $0x150] sm:$0xff]   ;;  %v1377_v43 = vld [vmem:[%s1751_s1 + $0x198] sm:$0xff]  }
   0xf   :  { %1153 = vmatpush3.bf16.msra.mxu0 %v1341_v11  ;;  %v1378_v44 = vld [vmem:[%s1751_s1 + $0x158] sm:$0xff]   ;;  %v1379_v45 = vld [vmem:[%s1751_s1 + $0x120] sm:$0xff]   ;;  %v1383_v49 = vld [vmem:[%s1751_s1 + $0x128] sm:$0xff]  }
  0x10   :  { %1255 = vmatpush3.bf16.msra.mxu1 %v1342_v12  ;;  %1154 = vmatprep.subr.bf16.mxu0 %v1343_v13  ;;  %v1380_v46 = vld [vmem:[%s1751_s1 + $0xe0] sm:$0xff]   ;;  %v1384_v50 = vld [vmem:[%s1751_s1 + $0xe8] sm:$0xff]   ;;  %v1387_v53 = vld [vmem:[%s1751_s1 + $0x130] sm:$0xff]  }
  0x11   :  { %1256 = vmatprep.subr.bf16.mxu1 %v1424_v1  ;;  %v1381_v47 = vld [vmem:[%s1751_s1 + $0x1a0] sm:$0xff]   ;;  %v1385_v51 = vld [vmem:[%s1751_s1 + $0x1a8] sm:$0xff]   ;;  %v1388_v54 = vld [vmem:[%s1751_s1 + $0xf0] sm:$0xff]  }
  0x12   :  { %v1382_v48 = vld [vmem:[%s1751_s1 + $0x160] sm:$0xff]   ;;  %v1386_v52 = vld [vmem:[%s1751_s1 + $0x168] sm:$0xff]   ;;  %v1389_v55 = vld [vmem:[%s1751_s1 + $0x1b0] sm:$0xff]  }
  0x13   :  { %1155 = vmatpush3.bf16.msra.mxu0 %v1344_v14  ;;  %v1390_v56 = vld [vmem:[%s1751_s1 + $0x170] sm:$0xff]   ;;  %v1391_v57 = vld [vmem:[%s1751_s1 + $0x138] sm:$0xff]   ;;  %v1047_v63 = vld [vmem:[%s1753_s2] ss:$0 sm:$0xff] }
  0x14   :  { %1257 = vmatpush3.bf16.msra.mxu1 %v1345_v15  ;;  %1156 = vmatprep.subr.bf16.mxu0 %v1346_v16  ;;  %v1393_v58 = vld [vmem:[%s1751_s1 + $0x1b8] sm:$0xff]   ;;  %v1408_v39 = vld [vmem:[%s1751_s1 + $0x200] sm:$0xff]  }
  0x15   :  { %1258 = vmatprep.subr.bf16.mxu1 %v1424_v1  ;;  %v1392_v59 = vld [vmem:[%s1751_s1 + $0xf8] sm:$0xff]  }
  0x16   :  { %v1394_v60 = vld [vmem:[%s1751_s1 + $0x178] sm:$0xff]  }
  0x17   :  { %1157 = vmatpush3.bf16.msra.mxu0 %v1347_v17 }
  0x18   :  { %1259 = vmatpush3.bf16.msra.mxu1 %v1348_v18  ;;  %1158 = vmatprep.subr.bf16.mxu0 %v1349_v19 }
  0x19   :  { %1260 = vmatprep.subr.bf16.mxu1 %v1424_v1 }
  0x1b   :  { %1159 = vmatpush3.bf16.msra.mxu0 %v1350_v20 }
  0x1c   :  { %1261 = vmatpush3.bf16.msra.mxu1 %v1351_v21  ;;  %1160 = vmatprep.subr.bf16.mxu0 %v1352_v22 }
  0x1d   :  { %1262 = vmatprep.subr.bf16.mxu1 %v1424_v1 }
  0x1f   :  { %1161 = vmatpush3.bf16.msra.mxu0 %v1353_v24 }
  0x20   :  { %1263 = vmatpush3.bf16.msra.mxu1 %v1357_v25  ;;  %1177 = vmatprep.subr.bf16.mxu0 %v1363_v28  ;;  %v1399_v28 = vld [vmem:[%s1751_s1 + $0x1c0] sm:$0xff]  }
  0x21   :  { %1199 = vmatprep.subr.bf16.mxu1 %v1365_v30 }
  0x22   :  { %265 = vmatmul.mubr.bf16.vlgmr.msra.gmra.mrb[0].mxu0 %v1354_v26 }
  0x23   :  { %1265 = vmatmul.mubr.bf16.vlgmr.msra.gmra.mrb[0].mxu1 %v1358_v27  ;;  %1178 = vmatpush3.bf16.msra.mxu0 %v1364_v29 }
  0x24   :  { %1200 = vmatpush3.bf16.msra.mxu1 %v1366_v31  ;;  %1179 = vmatprep.subr.bf16.mxu0 %v1367_v32  ;;  %v1400_v31 = vld [vmem:[%s1751_s1 + $0x1c8] sm:$0xff]   ;;  %v1401_v32 = vld [vmem:[%s1751_s1 + $0x1d0] sm:$0xff]  }
  0x25   :  { %1201 = vmatprep.subr.bf16.mxu1 %v1369_v34  ;;  %v1403_v34 = vld [vmem:[%s1751_s1 + $0x1e0] sm:$0xff]  }
  0x27   :  { %1180 = vmatpush3.bf16.msra.mxu0 %v1368_v33  ;;  %v1402_v33 = vld [vmem:[%s1751_s1 + $0x1d8] sm:$0xff]  }
  0x28   :  { %1202 = vmatpush3.bf16.msra.mxu1 %v1370_v35  ;;  %1181 = vmatprep.subr.bf16.mxu0 %v1371_v36  ;;  %v1404_v35 = vld [vmem:[%s1751_s1 + $0x1e8] sm:$0xff]   ;;  %v1405_v36 = vld [vmem:[%s1751_s1 + $0x1f0] sm:$0xff]  }
  0x29   :  { %1203 = vmatprep.subr.bf16.mxu1 %v1373_v38 }
  0x2b   :  { %1182 = vmatpush3.bf16.msra.mxu0 %v1372_v37  ;;  %v1406_v37 = vld [vmem:[%s1751_s1 + $0x1f8] sm:$0xff]  }
  0x2c   :  { %1204 = vmatpush3.bf16.msra.mxu1 %v1374_v40  ;;  %1183 = vmatprep.subr.bf16.mxu0 %v1375_v41  ;;  %v1409_v40 = vld [vmem:[%s1751_s1 + $0x208] sm:$0xff]   ;;  %v1410_v41 = vld [vmem:[%s1751_s1 + $0x210] sm:$0xff]  }
  0x2d   :  { %1205 = vmatprep.subr.bf16.mxu1 %v1377_v43  ;;  %v1412_v43 = vld [vmem:[%s1751_s1 + $0x220] sm:$0xff]  }
  0x2f   :  { %1184 = vmatpush3.bf16.msra.mxu0 %v1376_v42  ;;  %v1411_v42 = vld [vmem:[%s1751_s1 + $0x218] sm:$0xff]  }
  0x30   :  { %1206 = vmatpush3.bf16.msra.mxu1 %v1378_v44  ;;  %1185 = vmatprep.subr.bf16.mxu0 %v1379_v45  ;;  %v1413_v44 = vld [vmem:[%s1751_s1 + $0x228] sm:$0xff]   ;;  %v1414_v45 = vld [vmem:[%s1751_s1 + $0x230] sm:$0xff]  }
  0x31   :  { %1207 = vmatprep.subr.bf16.mxu1 %v1381_v47  ;;  %v1416_v47 = vld [vmem:[%s1751_s1 + $0x240] sm:$0xff]  }
  0x33   :  { %1186 = vmatpush3.bf16.msra.mxu0 %v1380_v46  ;;  %v1415_v46 = vld [vmem:[%s1751_s1 + $0x238] sm:$0xff]  }
  0x34   :  { %1208 = vmatpush3.bf16.msra.mxu1 %v1382_v48  ;;  %1187 = vmatprep.subr.bf16.mxu0 %v1383_v49  ;;  %v1417_v48 = vld [vmem:[%s1751_s1 + $0x248] sm:$0xff]   ;;  %v1418_v49 = vld [vmem:[%s1751_s1 + $0x250] sm:$0xff]  }
  0x35   :  { %1209 = vmatprep.subr.bf16.mxu1 %v1385_v51  ;;  %v1420_v51 = vld [vmem:[%s1751_s1 + $0x260] sm:$0xff]  }
  0x37   :  { %1188 = vmatpush3.bf16.msra.mxu0 %v1384_v50  ;;  %v1419_v50 = vld [vmem:[%s1751_s1 + $0x258] sm:$0xff]  }
  0x38   :  { %1210 = vmatpush3.bf16.msra.mxu1 %v1386_v52  ;;  %1189 = vmatprep.subr.bf16.mxu0 %v1387_v53  ;;  %v1421_v52 = vld [vmem:[%s1751_s1 + $0x268] sm:$0xff]  }
  0x39   :  { %1211 = vmatprep.subr.bf16.mxu1 %v1389_v55  ;;  %v1082_v55 = vld [vmem:[%s1753_s2 + $0x1] ss:$0 sm:$0xff] }
  0x3b   :  { %1190 = vmatpush3.bf16.msra.mxu0 %v1388_v54 }
  0x3c   :  { %1212 = vmatpush3.bf16.msra.mxu1 %v1390_v56  ;;  %1191 = vmatprep.subr.bf16.mxu0 %v1391_v57 }
  0x3d   :  { %1213 = vmatprep.subr.bf16.mxu1 %v1393_v58 }
  0x3f   :  { %1192 = vmatpush3.bf16.msra.mxu0 %v1392_v59 }
  0x40   :  { %1214 = vmatpush3.bf16.msra.mxu1 %v1394_v60  ;;  %1268 = vmatprep.subr.bf16.mxu0 %v1424_v1 }
  0x41   :  { %1288 = vmatprep.subr.bf16.mxu1 %v1424_v1 }
  0xf5   :  { %v1162_v61 = vpop.f32.mrb[0].mxu0 }
  0xf6   :  { %v1163_v62 = vpop.f32.mrb[1].mxu0  ;;  %v307_v0 = vpop.f32.mrb[0].mxu1 }
  0xf7   :  { %v1164_v2 = vadd.f32 %v1163_v62, %v1162_v61  ;;  %v1165_v3 = vpop.f32.mrb[2].mxu0  ;;  %v1266_v4 = vpop.f32.mrb[1].mxu1 }
  0xf8   :  { %v1166_v5 = vpop.f32.mrb[3].mxu0  ;;  %v310_v6 = vpop.f32.mrb[2].mxu1 }
  0xf9   :  { %v267_v7 = vadd.f32 %v1164_v2, %v1047_v63  ;;  %v1167_v8 = vadd.f32 %v1166_v5, %v1165_v3  ;;  %v1267_v9 = vpop.f32.mrb[3].mxu1 }
  0xfb   :  { %v308_v10 = vadd.f32 %v307_v0, %v267_v7  ;;  %v270_v11 = vadd.f32 %v1167_v8, %v1047_v63 }
  0xfd   :  { %v311_v12 = vadd.f32 %v310_v6, %v270_v11  ;;  %v314_v13 = vmax.f32 %v308_v10, 0.0  ;;  %v1422_v10 = vld [vmem:[%s1751_s1 + $0x270] sm:$0xff]   ;;  %v1423_v11 = vld [vmem:[%s1751_s1 + $0x278] sm:$0xff]  }
  0xff   :  { %v315_v14 = vmax.f32 %v311_v12, 0.0  ;;  %v1128_v12 = vld [vmem:[%s1753_s2 + $0x2] ss:$0 sm:$0xff] }
 0x101   :  { %v316_v15 = vpack.c.bf16 %v315_v14, %v314_v13 }
 0x103   :  { %317 = vst [vmem:[#allocation2] sm:$0xff] %v316_v15 }
 0x10a   :  { %v321_v16 = vld [vmem:[#allocation2] sm:$0x1]  ;;  %v1362_v23 = vld [vmem:[#allocation2 + $0x4] ss:$0 sps:$4 sm:$0x11]  }
 0x10b   :  { %322 = vst [vmem:[#allocation3] sm:$0x1] %v321_v16  ;;  %v1359_v17 = vld [vmem:[#allocation2] ss:$0 sps:$4 sm:$0x22]  }
 0x10c   :  { %v1360_v18 = vld [vmem:[#allocation2] ss:$0 sps:$4 sm:$0x44]   ;;  %v1076_v20 = vrot.slane %v1359_v17, 9  ;;  %352 = vst [vmem:[#allocation3 + $0x10] sm:$0x1] %v1362_v23 }
 0x10d   :  { %v1361_v19 = vld [vmem:[#allocation2] ss:$0 sps:$4 sm:$0x88]   ;;  %v1078_v21 = vrot.slane %v1360_v18, 10 }
 0x10e   :  { %v1080_v22 = vrot.slane %v1361_v19, 11  ;;  %330 = vst [vmem:[#allocation3 + $0x4] sm:$0x1] %v1076_v20 }
 0x10f   :  { %338 = vst [vmem:[#allocation3 + $0x8] sm:$0x1] %v1078_v21 }
 0x110   :  { %346 = vst [vmem:[#allocation3 + $0xc] sm:$0x1] %v1080_v22 }
 0x113   :  { %v1407_v38 = vld [vmem:[#allocation3 + $0x10] ss:$0 sps:$4 sm:$0xff]  }
 0x115   :  { %v353_v24 = vld [vmem:[#allocation3] sm:$0xff] }
 0x116   :  { %v1083_v25 = vcombine.low %v353_v24, %v353_v24  ;;  %v1084_v26 = vcombine.high %v353_v24, %v353_v24 }
 0x117   :  { %v354_v27 = vld [vmem:[#allocation3 + $0x8] sm:$0xff] }
 0x118   :  { %v1085_v29 = vcombine.low %v354_v27, %v354_v27  ;;  %v1086_v30 = vcombine.high %v354_v27, %v354_v27  ;;  %731 = vmatprep.mubr.bf16.mxu0 %v1084_v26 }
 0x119   :  { %732 = vmatmul.mubr.bf16.vlgmr.msra.gmra.mrb[4].mxu0 %v1083_v25 }
 0x11a   :  { %771 = vmatprep.mubr.bf16.mxu1 %v1086_v30  ;;  %1269 = vmatpush3.bf16.msra.mxu0 %v1399_v28 }
 0x11b   :  { %772 = vmatmul.mubr.bf16.vlgmr.msra.gmra.mrb[4].mxu1 %v1085_v29  ;;  %1270 = vmatprep.subr.bf16.mxu0 %v1424_v1 }
 0x11c   :  { %1284 = vmatprep.mubr.msk.bf16.mxu0 %vm1425_vm0, %v1424_v1  ;;  %1304 = vmatprep.mubr.msk.bf16.mxu1 %vm1425_vm0, %v1424_v1 }
 0x11d   :  { %1289 = vmatpush3.bf16.msra.mxu1 %v1408_v39 }
 0x11e   :  { %1271 = vmatpush3.bf16.msra.mxu0 %v1400_v31  ;;  %1290 = vmatprep.subr.bf16.mxu1 %v1424_v1 }
 0x11f   :  { %1272 = vmatprep.subr.bf16.mxu0 %v1424_v1 }
 0x121   :  { %1291 = vmatpush3.bf16.msra.mxu1 %v1409_v40 }
 0x122   :  { %1273 = vmatpush3.bf16.msra.mxu0 %v1401_v32  ;;  %1292 = vmatprep.subr.bf16.mxu1 %v1424_v1 }
 0x123   :  { %1274 = vmatprep.subr.bf16.mxu0 %v1424_v1 }
 0x125   :  { %1293 = vmatpush3.bf16.msra.mxu1 %v1410_v41 }
 0x126   :  { %1275 = vmatpush3.bf16.msra.mxu0 %v1402_v33  ;;  %1294 = vmatprep.subr.bf16.mxu1 %v1424_v1 }
 0x127   :  { %1276 = vmatprep.subr.bf16.mxu0 %v1424_v1 }
 0x129   :  { %1295 = vmatpush3.bf16.msra.mxu1 %v1411_v42 }
 0x12a   :  { %1277 = vmatpush3.bf16.msra.mxu0 %v1403_v34  ;;  %1296 = vmatprep.subr.bf16.mxu1 %v1424_v1 }
 0x12b   :  { %1278 = vmatprep.subr.bf16.mxu0 %v1424_v1 }
 0x12d   :  { %1297 = vmatpush3.bf16.msra.mxu1 %v1412_v43 }
 0x12e   :  { %1279 = vmatpush3.bf16.msra.mxu0 %v1404_v35  ;;  %1298 = vmatprep.subr.bf16.mxu1 %v1424_v1 }
 0x12f   :  { %1280 = vmatprep.subr.bf16.mxu0 %v1424_v1 }
 0x131   :  { %1299 = vmatpush3.bf16.msra.mxu1 %v1413_v44 }
 0x132   :  { %1281 = vmatpush3.bf16.msra.mxu0 %v1405_v36  ;;  %1300 = vmatprep.subr.bf16.mxu1 %v1424_v1 }
 0x133   :  { %1282 = vmatprep.subr.bf16.mxu0 %v1424_v1 }
 0x135   :  { %1301 = vmatpush3.bf16.msra.mxu1 %v1414_v45 }
 0x136   :  { %1283 = vmatpush3.bf16.msra.mxu0 %v1406_v37  ;;  %1302 = vmatprep.subr.bf16.mxu1 %v1424_v1 }
 0x137   :  { %1308 = vmatprep.subr.bf16.mxu0 %v1424_v1 }
 0x139   :  { %1285 = vmatmul.mubr.bf16.vlgmr.msra.gmra.mrb[8].mxu0 %v1407_v38  ;;  %1303 = vmatpush3.bf16.msra.mxu1 %v1415_v46 }
 0x13a   :  { %1324 = vmatprep.mubr.msk.bf16.mxu0 %vm1425_vm0, %v1424_v1  ;;  %1309 = vmatpush3.bf16.msra.mxu0 %v1416_v47 }
 0x13b   :  { %1310 = vmatprep.subr.bf16.mxu0 %v1424_v1 }
 0x13e   :  { %1311 = vmatpush3.bf16.msra.mxu0 %v1417_v48 }
 0x13f   :  { %1312 = vmatprep.subr.bf16.mxu0 %v1424_v1 }
 0x142   :  { %1313 = vmatpush3.bf16.msra.mxu0 %v1418_v49 }
 0x143   :  { %1314 = vmatprep.subr.bf16.mxu0 %v1424_v1 }
 0x146   :  { %1315 = vmatpush3.bf16.msra.mxu0 %v1419_v50 }
 0x147   :  { %1316 = vmatprep.subr.bf16.mxu0 %v1424_v1 }
 0x14a   :  { %1317 = vmatpush3.bf16.msra.mxu0 %v1420_v51 }
 0x14b   :  { %1318 = vmatprep.subr.bf16.mxu0 %v1424_v1 }
 0x14e   :  { %1319 = vmatpush3.bf16.msra.mxu0 %v1421_v52 }
 0x14f   :  { %1320 = vmatprep.subr.bf16.mxu0 %v1424_v1 }
 0x152   :  { %1321 = vmatpush3.bf16.msra.mxu0 %v1422_v10 }
 0x153   :  { %1322 = vmatprep.subr.bf16.mxu0 %v1424_v1  ;;  %v1137_v1 = vld [vmem:[%s1753_s2 + $0x3] ss:$0 sm:$0xff] }
 0x156   :  { %1323 = vmatpush3.bf16.msra.mxu0 %v1423_v11 }
 0x1ec   :  { %v1193_v53 = vpop.f32.mrb[4].mxu0 }
 0x1ed   :  { %v1194_v56 = vpop.f32.mrb[5].mxu0 }
 0x1ee   :  { %v1215_v54 = vpop.f32.mrb[4].mxu1  ;;  %v1195_v57 = vadd.f32 %v1194_v56, %v1193_v53  ;;  %v1196_v59 = vpop.f32.mrb[6].mxu0 }
 0x1ef   :  { %v1216_v58 = vpop.f32.mrb[5].mxu1  ;;  %v1197_v62 = vpop.f32.mrb[7].mxu0 }
 0x1f0   :  { %v1217_v60 = vadd.f32 %v1216_v58, %v1215_v54  ;;  %v1218_v61 = vpop.f32.mrb[6].mxu1  ;;  %v734_v63 = vadd.f32 %v1195_v57, %v1082_v55 }
 0x1f1   :  { %v1219_v0 = vpop.f32.mrb[7].mxu1 }
 0x1f2   :  { %v774_v2 = vadd.f32 %v1217_v60, %v734_v63 }
 0x20c   :  { %v813_v3 = vpop.f32.mrb[8].mxu0 }
 0x20d   :  { %v814_v4 = vadd.f32 %v813_v3, %v774_v2  ;;  %v1286_v5 = vpop.f32.mrb[9].mxu0 }
 0x20e   :  { %v816_v6 = vpop.f32.mrb[10].mxu0 }
 0x20f   :  { %v819_v7 = vmax.f32 %v814_v4, 0.0  ;;  %v1287_v8 = vpop.f32.mrb[11].mxu0 }
 0x211   :  { %v820_v9 = vpack.c.bf16 %v819_v7, %v819_v7 }
 0x213   :  { %1305 = vmatmul.mubr.bf16.vlgmr.msra.gmra.mrb[8].mxu1 %v820_v9 }
 0x2e6   :  { %v924_v13 = vpop.f32.mrb[8].mxu1 }
 0x2e7   :  { %v925_v14 = vadd.f32 %v1128_v12, %v924_v13  ;;  %v1306_v15 = vpop.f32.mrb[9].mxu1 }
 0x2e8   :  { %v927_v16 = vpop.f32.mrb[10].mxu1 }
 0x2e9   :  { %v930_v17 = vmax.f32 %v925_v14, 0.0  ;;  %v1307_v18 = vpop.f32.mrb[11].mxu1 }
 0x2eb   :  { %v931_v19 = vpack.c.bf16 %v930_v17, %v930_v17 }
 0x2ed   :  { %1325 = vmatmul.mubr.bf16.vlgmr.msra.gmra.mrb[12].mxu0 %v931_v19 }
 0x3c0   :  { %v1035_v20 = vpop.f32.mrb[12].mxu0 }
 0x3c1   :  { %v1036_v21 = vadd.f32 %v1137_v1, %v1035_v20  ;;  %v1326_v22 = vpop.f32.mrb[13].mxu0 }
 0x3c2   :  { %v1038_v23 = vpop.f32.mrb[14].mxu0 }
 0x3c3   :  { %v1041_v24 = vmax.f32 %v1036_v21, 0.0  ;;  %v1327_v25 = vpop.f32.mrb[15].mxu0 }
 0x3c5   :  { %1042 = vst [vmem:[%s1754_s3] sm:$0xff] %v1041_v24 }

</bundles_post_ra>
